<compile_context>
chip_gen: v5e
topology: v5e:2x2
jax: 0.10.0
libtpu: 0.0.40
codegen_flags: <defaults>
</compile_context>

<pallas_src>
import jax
import jax.numpy as jnp
from jax import lax
from jax.experimental import pallas as pl
from jax.experimental.pallas import tpu as pltpu


def _round_up(x, m):
    return ((x + m - 1) // m) * m


def _make_kernel(K, Bt, S, stacked, unroll):
    def kernel(x_ref, w_ref, b_ref, o_ref):
        # x_ref : (Bt, C_in, S)   zero-padded per-batch segments
        # w_ref : (C_out, K*C_in) fused weight        (stacked path / K==1)
        #         (K, C_out, C_in) per-tap weights    (fallback path)
        # b_ref : (C_out, 1)      fused bias, f32
        # o_ref : (Bt, C_out, S)  lane-dense output block
        bias = b_ref[...]
        if stacked:
            w = w_ref[...]
        else:
            w_taps = [w_ref[t] for t in range(K)]

        def body(b, carry):
            xb = x_ref[b]                                    # (C_in, S)
            if K == 1:
                r = jnp.dot(w, xb, preferred_element_type=jnp.float32)
            elif stacked:
                # stacked[t*C_in + c, s] = x[c, s + t] (wrap lands in cols >= L)
                pieces = [xb] + [pltpu.roll(xb, S - t, 1) for t in range(1, K)]
                r = jnp.dot(w, jnp.concatenate(pieces, axis=0),
                            preferred_element_type=jnp.float32)
            else:
                r = jnp.dot(w_taps[0], xb, preferred_element_type=jnp.float32)
                for t in range(1, K):
                    r = r + jnp.dot(w_taps[t], pltpu.roll(xb, S - t, 1),
                                    preferred_element_type=jnp.float32)
            o_ref[b] = (r + bias).astype(o_ref.dtype)
            return carry

        lax.fori_loop(0, Bt, body, 0, unroll=unroll)

    return kernel


def depth_pointwise_conv1d(x, w_depth, b_depth, w_point, b_point, kernel_size):
    """x: (B, C_in, L) -> (B, C_out, L).

    w_depth: (C_in, K), b_depth: (C_in,) (both ignored when K == 1),
    w_point: (C_out, C_in), b_point: (C_out,).
    """
    B, C_in, L = x.shape
    C_out = w_point.shape[0]
    K = int(kernel_size)
    if K != 1 and K % 2 == 0:
        raise ValueError("kernel_size must be 1 or odd "
                         "(even K changes output length in PyTorch)")
    pad = 0 if K == 1 else K // 2

    dtype = x.dtype
    itemsize = jnp.dtype(dtype).itemsize
    sublane_mult = 8 * max(1, 4 // itemsize)     # f32: 8, bf16: 16, int8/fp8: 32
    use_stacked = (K == 1) or (C_in % sublane_mult == 0)

    # ---- fold depthwise conv into the pointwise matmul (wrapper-side) --------
    wp32 = w_point.astype(jnp.float32).reshape(C_out, C_in)
    if K == 1:
        w_arr = wp32.astype(dtype)                                   # (C_out, C_in)
        b_fused = b_point.astype(jnp.float32).reshape(C_out, 1)
    else:
        wd32 = w_depth.astype(jnp.float32).reshape(C_in, K)
        # w_taps[t, o, c] = w_point[o, c] * w_depth[c, t]
        w_taps = wp32[None, :, :] * wd32.T[:, None, :]               # (K, C_out, C_in)
        if use_stacked:
            # single matmul, contraction K*C_in: W2[o, t*C_in + c]
            w_arr = (jnp.transpose(w_taps, (1, 0, 2))
                        .reshape(C_out, K * C_in).astype(dtype))
        else:
            w_arr = w_taps.astype(dtype)
        b_fused = (wp32 @ b_depth.astype(jnp.float32).reshape(C_in, 1)
                   + b_point.astype(jnp.float32).reshape(C_out, 1))

    # ---- lane-dense per-batch segments ----------------------------------------
    # Each sequence lives at columns [pad, pad+L) of an S-wide segment; output
    # columns [L, S) are discarded, which also absorbs the K-1 wrapped lanes
    # produced by pltpu.roll (S >= L + K - 1 by construction).
    S = _round_up(L + (K - 1), 128)

    # ---- per-generation VMEM / core budgets ------------------------------------
    try:
        vmem_cap = int(pltpu.get_tpu_info().vmem_capacity_bytes)
    except Exception:
        vmem_cap = 64 << 20                      # conservative default (v7x)
    vmem_budget = (3 * vmem_cap) // 4            # headroom for Mosaic scratch
    try:
        kind = jax.devices()[0].device_kind.lower()
    except Exception:
        kind = ""
    num_tc = 2 if any(t in kind for t in ("v4", "v5p", "v7", "7x")) else 1

    # Per-step VMEM: double-buffered I/O blocks + resident weights + stacked
    # operand + f32 matmul result (transient, one batch at a time).
    act_budget = min(24 << 20, vmem_budget // 4)
    fixed = S * (K * C_in * itemsize + C_out * 4) + 2 * (w_arr.size + C_out) * itemsize
    per_batch = 2 * S * (C_in + C_out) * itemsize
    Bt = int(min(B, max(1, (act_budget - fixed) // per_batch)))

    G = -(-B // Bt)
    min_steps = 2 * num_tc                       # >= 2 pipelined steps per core
    if G < min_steps and B > 1:
        bt_split = max(1, -(-B // min_steps))
        # Single-core chips: only split if per-step DMA stays big enough to be
        # worth pipelining.  Multi-core chips: always feed every TensorCore.
        if num_tc > 1 or bt_split * per_batch >= (1 << 20):
            Bt = min(Bt, bt_split)
            G = -(-B // Bt)
    B_pad = G * Bt

    step_bytes = Bt * per_batch + fixed
    vmem_limit = int(min(vmem_budget, max(32 << 20, 2 * step_bytes)))

    # Single padding pass: batch -> B_pad, sequence -> S with data at [pad, pad+L).
    x_pad = jnp.pad(x, ((0, B_pad - B), (0, 0), (pad, S - pad - L)))

    out_pad = pl.pallas_call(
        _make_kernel(K, Bt, S, use_stacked, bool(Bt <= 8)),
        out_shape=jax.ShapeDtypeStruct((B_pad, C_out, S), dtype),
        grid_spec=pltpu.PrefetchScalarGridSpec(
            num_scalar_prefetch=0,
            grid=(G,),
            in_specs=[
                pl.BlockSpec((Bt, C_in, S), lambda g: (g, 0, 0)),
                pl.BlockSpec(w_arr.shape, lambda g: (0,) * w_arr.ndim),
                pl.BlockSpec((C_out, 1), lambda g: (0, 0)),
            ],
            out_specs=pl.BlockSpec((Bt, C_out, S), lambda g: (g, 0, 0)),
        ),
        compiler_params=pltpu.CompilerParams(
            dimension_semantics=("parallel",),
            vmem_limit_bytes=vmem_limit,
        ),
    )(x_pad, w_arr, b_fused)

    return out_pad[:B, :, :L]


def _reference(x, w_depth, b_depth, w_point, b_point, kernel_size):
    """Plain-JAX reference mirroring the PyTorch module."""
    B, C_in, L = x.shape
    C_out = w_point.shape[0]
    K = int(kernel_size)
    xf = x.astype(jnp.float32)
    if K == 1:
        d = xf
    else:
        d = lax.conv_general_dilated(
            xf,
            w_depth.astype(jnp.float32).reshape(C_in, 1, K),
            window_strides=(1,),
            padding=[(K // 2, K // 2)],
            dimension_numbers=("NCH", "OIH", "NCH"),
            feature_group_count=C_in,
        ) + b_depth.astype(jnp.float32).reshape(1, C_in, 1)
    out = jnp.einsum("oc,bcl->bol",
                     w_point.astype(jnp.float32).reshape(C_out, C_in), d)
    out = out + b_point.astype(jnp.float32).reshape(1, C_out, 1)
    return out.astype(x.dtype)


if __name__ == "__main__":
    key = jax.random.PRNGKey(0)
    k1, k2, k3, k4, k5 = jax.random.split(key, 5)

    # Small shapes consistent with the module's forward (x: (B, C_in, L)).
    B, C_in, C_out, L, K = 2, 4, 8, 100, 3
    x = jax.random.normal(k1, (B, C_in, L), dtype=jnp.float32)
    w_depth = 0.1 * jax.random.normal(k2, (C_in, K), dtype=jnp.float32)
    b_depth = 0.1 * jax.random.normal(k3, (C_in,), dtype=jnp.float32)
    w_point = 0.1 * jax.random.normal(k4, (C_out, C_in), dtype=jnp.float32)
    b_point = 0.1 * jax.random.normal(k5, (C_out,), dtype=jnp.float32)

    # depthwise (K=3) + pointwise path (C_in=4 -> per-tap fallback path)
    out = jax.block_until_ready(
        depth_pointwise_conv1d(x, w_depth, b_depth, w_point, b_point, K))
    ref = _reference(x, w_depth, b_depth, w_point, b_point, K)
    assert out.shape == (B, C_out, L)
    assert jnp.allclose(out, ref, atol=2e-5, rtol=2e-5), "mismatch vs reference (K=3)"

    # kernel_size == 1 path (depth_conv == nn.Identity())
    out1 = jax.block_until_ready(
        depth_pointwise_conv1d(x, None, None, w_point, b_point, 1))
    ref1 = _reference(x, None, None, w_point, b_point, 1)
    assert out1.shape == (B, C_out, L)
    assert jnp.allclose(out1, ref1, atol=2e-5, rtol=2e-5), "mismatch vs reference (K=1)"

    # sublane-aligned C_in exercises the single stacked K*C_in-contraction matmul
    C_in2 = 8
    x2 = jax.random.normal(k1, (B, C_in2, L), dtype=jnp.float32)
    w_d2 = 0.1 * jax.random.normal(k2, (C_in2, K), dtype=jnp.float32)
    b_d2 = 0.1 * jax.random.normal(k3, (C_in2,), dtype=jnp.float32)
    w_p2 = 0.1 * jax.random.normal(k4, (C_out, C_in2), dtype=jnp.float32)
    out2 = jax.block_until_ready(
        depth_pointwise_conv1d(x2, w_d2, b_d2, w_p2, b_point, K))
    ref2 = _reference(x2, w_d2, b_d2, w_p2, b_point, K)
    assert out2.shape == (B, C_out, L)
    assert jnp.allclose(out2, ref2, atol=2e-5, rtol=2e-5), "mismatch vs reference (stacked)"

    print("KERNEL_OK")
</pallas_src>

<mosaic_0001>
module attributes {stable_mosaic.version = 11 : i64} {
  func.func @kernel(%arg0: i32, %arg1: memref<2x4x128xf32, #tpu.memory_space<vmem>>, %arg2: memref<3x8x4xf32, #tpu.memory_space<vmem>>, %arg3: memref<8x1xf32, #tpu.memory_space<vmem>>, %arg4: memref<2x8x128xf32, #tpu.memory_space<vmem>>) attributes {dimension_semantics = [#tpu.dimension_semantics<parallel>], iteration_bounds = array<i64: 1>, scalar_prefetch = 0 : i64, scratch_operands = 0 : i64, tpu.core_type = #tpu.core_type<tc>, window_params = [{transform_indices = @transform_0, window_bounds = array<i64: 2, 4, 128>}, {pipeline_mode = #tpu.pipeline_mode<synchronous>, transform_indices = @transform_1, window_bounds = array<i64: 3, 8, 4>}, {pipeline_mode = #tpu.pipeline_mode<synchronous>, transform_indices = @transform_2, window_bounds = array<i64: 8, 1>}, {transform_indices = @transform_3, window_bounds = array<i64: 2, 8, 128>}]} {
    %c0 = arith.constant 0 : index
    %c0_0 = arith.constant 0 : index
    %0 = vector.load %arg3[%c0, %c0_0] : memref<8x1xf32, #tpu.memory_space<vmem>>, vector<8x1xf32>
    %c0_1 = arith.constant 0 : index
    %c0_2 = arith.constant 0 : index
    %c0_3 = arith.constant 0 : index
    %1 = vector.load %arg2[%c0_1, %c0_2, %c0_3] : memref<3x8x4xf32, #tpu.memory_space<vmem>>, vector<1x8x4xf32>
    %2 = vector.shape_cast %1 : vector<1x8x4xf32> to vector<8x4xf32>
    %c1 = arith.constant 1 : index
    %c0_4 = arith.constant 0 : index
    %c0_5 = arith.constant 0 : index
    %3 = vector.load %arg2[%c1, %c0_4, %c0_5] : memref<3x8x4xf32, #tpu.memory_space<vmem>>, vector<1x8x4xf32>
    %4 = vector.shape_cast %3 : vector<1x8x4xf32> to vector<8x4xf32>
    %c2 = arith.constant 2 : index
    %c0_6 = arith.constant 0 : index
    %c0_7 = arith.constant 0 : index
    %5 = vector.load %arg2[%c2, %c0_6, %c0_7] : memref<3x8x4xf32, #tpu.memory_space<vmem>>, vector<1x8x4xf32>
    %6 = vector.shape_cast %5 : vector<1x8x4xf32> to vector<8x4xf32>
    %c0_i32 = arith.constant 0 : i32
    %7 = arith.index_cast %c0_i32 : i32 to index
    %c0_8 = arith.constant 0 : index
    %c0_9 = arith.constant 0 : index
    %8 = vector.load %arg1[%7, %c0_8, %c0_9] : memref<2x4x128xf32, #tpu.memory_space<vmem>>, vector<1x4x128xf32>
    %9 = vector.shape_cast %8 : vector<1x4x128xf32> to vector<4x128xf32>
    %cst = arith.constant dense<0.000000e+00> : vector<8x128xf32>
    %10 = tpu.matmul %2, %9, %cst {dimension_numbers = #tpu.dot_dimension_numbers<[1], [0], [0], [1], [0, 0, 1, 1], [], []>} : vector<8x4xf32>, vector<4x128xf32>, vector<8x128xf32> -> vector<8x128xf32>
    %c127_i32 = arith.constant 127 : i32
    %11 = tpu.dynamic_rotate %9 by %c127_i32 dim 1 : vector<4x128xf32>, i32 -> vector<4x128xf32>
    %cst_10 = arith.constant dense<0.000000e+00> : vector<8x128xf32>
    %12 = tpu.matmul %4, %11, %cst_10 {dimension_numbers = #tpu.dot_dimension_numbers<[1], [0], [0], [1], [0, 0, 1, 1], [], []>} : vector<8x4xf32>, vector<4x128xf32>, vector<8x128xf32> -> vector<8x128xf32>
    %13 = arith.addf %10, %12 : vector<8x128xf32>
    %c126_i32 = arith.constant 126 : i32
    %14 = tpu.dynamic_rotate %9 by %c126_i32 dim 1 : vector<4x128xf32>, i32 -> vector<4x128xf32>
    %cst_11 = arith.constant dense<0.000000e+00> : vector<8x128xf32>
    %15 = tpu.matmul %6, %14, %cst_11 {dimension_numbers = #tpu.dot_dimension_numbers<[1], [0], [0], [1], [0, 0, 1, 1], [], []>} : vector<8x4xf32>, vector<4x128xf32>, vector<8x128xf32> -> vector<8x128xf32>
    %16 = arith.addf %13, %15 : vector<8x128xf32>
    %17 = vector.broadcast %0 : vector<8x1xf32> to vector<8x128xf32>
    %18 = arith.addf %16, %17 : vector<8x128xf32>
    %19 = arith.index_cast %c0_i32 : i32 to index
    %c0_12 = arith.constant 0 : index
    %c0_13 = arith.constant 0 : index
    %20 = vector.load %arg4[%19, %c0_12, %c0_13] : memref<2x8x128xf32, #tpu.memory_space<vmem>>, vector<1x8x128xf32>
    %21 = vector.shape_cast %20 : vector<1x8x128xf32> to vector<8x128xf32>
    %22 = vector.shape_cast %18 : vector<8x128xf32> to vector<1x8x128xf32>
    tpu.vector_store %arg4[%19, %c0_12, %c0_13], %22 {strides = array<i32>} : memref<2x8x128xf32, #tpu.memory_space<vmem>>, vector<1x8x128xf32>,
    %c1_i32 = arith.constant 1 : i32
    %23 = arith.index_cast %c1_i32 : i32 to index
    %c0_14 = arith.constant 0 : index
    %c0_15 = arith.constant 0 : index
    %24 = vector.load %arg1[%23, %c0_14, %c0_15] : memref<2x4x128xf32, #tpu.memory_space<vmem>>, vector<1x4x128xf32>
    %25 = vector.shape_cast %24 : vector<1x4x128xf32> to vector<4x128xf32>
    %cst_16 = arith.constant dense<0.000000e+00> : vector<8x128xf32>
    %26 = tpu.matmul %2, %25, %cst_16 {dimension_numbers = #tpu.dot_dimension_numbers<[1], [0], [0], [1], [0, 0, 1, 1], [], []>} : vector<8x4xf32>, vector<4x128xf32>, vector<8x128xf32> -> vector<8x128xf32>
    %c127_i32_17 = arith.constant 127 : i32
    %27 = tpu.dynamic_rotate %25 by %c127_i32_17 dim 1 : vector<4x128xf32>, i32 -> vector<4x128xf32>
    %cst_18 = arith.constant dense<0.000000e+00> : vector<8x128xf32>
    %28 = tpu.matmul %4, %27, %cst_18 {dimension_numbers = #tpu.dot_dimension_numbers<[1], [0], [0], [1], [0, 0, 1, 1], [], []>} : vector<8x4xf32>, vector<4x128xf32>, vector<8x128xf32> -> vector<8x128xf32>
    %29 = arith.addf %26, %28 : vector<8x128xf32>
    %c126_i32_19 = arith.constant 126 : i32
    %30 = tpu.dynamic_rotate %25 by %c126_i32_19 dim 1 : vector<4x128xf32>, i32 -> vector<4x128xf32>
    %cst_20 = arith.constant dense<0.000000e+00> : vector<8x128xf32>
    %31 = tpu.matmul %6, %30, %cst_20 {dimension_numbers = #tpu.dot_dimension_numbers<[1], [0], [0], [1], [0, 0, 1, 1], [], []>} : vector<8x4xf32>, vector<4x128xf32>, vector<8x128xf32> -> vector<8x128xf32>
    %32 = arith.addf %29, %31 : vector<8x128xf32>
    %33 = vector.broadcast %0 : vector<8x1xf32> to vector<8x128xf32>
    %34 = arith.addf %32, %33 : vector<8x128xf32>
    %35 = arith.index_cast %c1_i32 : i32 to index
    %c0_21 = arith.constant 0 : index
    %c0_22 = arith.constant 0 : index
    %36 = vector.load %arg4[%35, %c0_21, %c0_22] : memref<2x8x128xf32, #tpu.memory_space<vmem>>, vector<1x8x128xf32>
    %37 = vector.shape_cast %36 : vector<1x8x128xf32> to vector<8x128xf32>
    %38 = vector.shape_cast %34 : vector<8x128xf32> to vector<1x8x128xf32>
    tpu.vector_store %arg4[%35, %c0_21, %c0_22], %38 {strides = array<i32>} : memref<2x8x128xf32, #tpu.memory_space<vmem>>, vector<1x8x128xf32>,
    %c2_i32 = arith.constant 2 : i32
    return
  }
  func.func @transform_0(%arg0: i32) -> (i32, i32, i32) {
    %c0_i32 = arith.constant 0 : i32
    %c0_i32_0 = arith.constant 0 : i32
    %c0_i32_1 = arith.constant 0 : i32
    return %arg0, %c0_i32, %c0_i32_0 : i32, i32, i32
  }
  func.func @transform_1(%arg0: i32) -> (i32, i32, i32) {
    %c0_i32 = arith.constant 0 : i32
    %c0_i32_0 = arith.constant 0 : i32
    %c0_i32_1 = arith.constant 0 : i32
    %c0_i32_2 = arith.constant 0 : i32
    return %c0_i32, %c0_i32_0, %c0_i32_1 : i32, i32, i32
  }
  func.func @transform_2(%arg0: i32) -> (i32, i32) {
    %c0_i32 = arith.constant 0 : i32
    %c0_i32_0 = arith.constant 0 : i32
    %c0_i32_1 = arith.constant 0 : i32
    return %c0_i32, %c0_i32_0 : i32, i32
  }
  func.func @transform_3(%arg0: i32) -> (i32, i32, i32) {
    %c0_i32 = arith.constant 0 : i32
    %c0_i32_0 = arith.constant 0 : i32
    %c0_i32_1 = arith.constant 0 : i32
    return %arg0, %c0_i32, %c0_i32_0 : i32, i32, i32
  }
}

</mosaic_0001>

<bundles_post_ra>
// kernel: tpu_custom_call.1
= control target key start
LH: loop header
LB: loop body
LE: loop exit
PB: predicated region body
PF: predicated region fallthrough
CT: control target
= control target key end

     0   :  { %s260_s14 = smov 127   ;;  %s261_s15 = smov 126   ;;  %s319_s0 = inlined_call_operand.vmem [shape: f32[2,4,128], index: 0, kind: input, shape index: {}]   ;;  %s320_s1 = inlined_call_operand.vmem [shape: f32[3,8,4], index: 1, kind: input, shape index: {}]   ;;  %s321_s2 = inlined_call_operand.vmem [shape: f32[8,1], index: 2, kind: input, shape index: {}]   ;;  %s322_s3 = inlined_call_operand.hbm [shape: f32[2,8,128], index: 3, kind: output, shape index: {}]  }
   0x1   :  { %v21_v0 = vld [vmem:[%s319_s0] sm:$0xf] }
   0x2   :  { %22 = vrot.lane.b32.xlu0 %v21_v0, %s260_s14  ;;  %78 = vrot.lane.b32.xlu1 %v21_v0, %s261_s15 }
   0x3   :  { %8 = vsyncpa [#allocation3], 0  ;;  %v219_v1 = vld [vmem:[%s319_s0 + $0x4] sm:$0xf]  ;;  %vm28_vm0 = vcmask 1043456   ;;  %vm24_vm1 = vcmask 31744  }
   0x4   :  { %215 = vmatpush.msk.msra.mxu1 %vm28_vm0, %v21_v0  ;;  %v16_v2 = vld [vmem:[%s320_s1] sm:$0xff]  ;;  %v262_v4 = vmov 0   ;;  %v212_v5 = vld [vmem:[%s320_s1 + $0x10] sm:$0xff]  ;;  %v211_v8 = vld [vmem:[%s320_s1 + $0x8] sm:$0xff]  ;;  %s263_s1 = smov [#allocation2]   ;;  %s199_s27 = sshll.u32 %s322_s3, 4  ;;  %s200_s27 = int_to_ptr.hbm [resolvable:$true] %s199_s27 }
   0x5   :  { %216 = vmatmul.msk.f32.vlgmr.msra.gmra.mxu1 %vm24_vm1, %v16_v2  ;;  %v15_v3 = vld [vmem:[%s321_s2] sm:$0xff]  ;;  %232 = vset.pattern.permute.xlu2 %v262_v4  ;;  %s197_s2 = sshll.u32 %s263_s1, 4  ;;  %s264_s28 = smov 128   ;;  %s198_s2 = int_to_ptr.vmem [resolvable:$true] %s197_s2 }
   0x6   :  { %233 = vset.pattern.permute.xlu0 %v262_v4  ;;  %109 = vperm.xlu2 %232, %v15_v3   ;;  %s265_s29 = smov 8  }
   0xa   :  { %116 = vrot.lane.b32.xlu0 %v219_v1, %s260_s14  ;;  %164 = vrot.lane.b32.xlu1 %v219_v1, %s261_s15 }
  0x60   :  { %v110_v15 = vpop.permute.xlu2 %109 }
  0x74   :  { %v23_v6 = vpop.permute.xlu0 %22  ;;  %v79_v7 = vpop.permute.xlu1 %78 }
  0x75   :  { %213 = vmatpush.msk.msra.mxu0 %vm28_vm0, %v23_v6  ;;  %217 = vmatpush.msk.msra.mxu2 %vm28_vm0, %v79_v7 }
  0x76   :  { %218 = vmatmul.msk.f32.vlgmr.msra.gmra.mxu2 %vm24_vm1, %v212_v5  ;;  %214 = vmatmul.msk.f32.vlgmr.msra.gmra.mxu0 %vm24_vm1, %v211_v8 }
  0x77   :  { %222 = vmatpush.msk.msrb.mxu0 %vm28_vm0, %v219_v1 }
  0x7c   :  { %v117_v9 = vpop.permute.xlu0 %116  ;;  %v165_v10 = vpop.permute.xlu1 %164 }
  0x7d   :  { %220 = vmatpush.msk.msra.mxu3 %vm28_vm0, %v117_v9  ;;  %224 = vmatpush.msk.msrb.mxu1 %vm28_vm0, %v165_v10 }
  0x7e   :  { %221 = vmatmul.msk.f32.vlgmr.msra.gmra.mxu3 %vm24_vm1, %v211_v8  ;;  %225 = vmatmul.msk.f32.vlgmr.msrb.gmra.mxu1 %vm24_vm1, %v212_v5 }
  0x7f   :  { %223 = vmatmul.msk.f32.vlgmr.msrb.gmra.mxu0 %vm24_vm1, %v16_v2 }
  0x82   :  { %v75_v11 = vpop.f32.mrf.mxu1 }
  0xf3   :  { %v49_v12 = vpop.f32.mrf.mxu0 }
  0xf4   :  { %v76_v13 = vadd.f32 %v75_v11, %v49_v12 }
  0xf9   :  { %v103_v14 = vpop.f32.mrf.mxu2 }
  0xfa   :  { %v106_v16 = vadd.f32 %v103_v14, %v76_v13 }
  0xfb   :  { %v186_v20 = vpop.f32.mrf.mxu1 }
  0xfc   :  { %v112_v17 = vadd.f32 %v110_v15, %v106_v16  ;;  %v161_v18 = vpop.f32.mrf.mxu0 }
  0xfe   :  { %113 = vst [vmem:[#allocation2] sm:$0xff] %v112_v17 }
 0x101   :  { %v138_v19 = vpop.f32.mrf.mxu3 }
 0x102   :  { %v162_v21 = vadd.f32 %v161_v18, %v138_v19 }
 0x104   :  { %v189_v22 = vadd.f32 %v186_v20, %v162_v21 }
 0x106   :  { %v190_v23 = vadd.f32 %v189_v22, %v110_v15 }
 0x108   :  { %192 = vst [vmem:[#allocation2 + $0x8] sm:$0xff] %v190_v23 }
 0x109   :  { %205 = dma.vmem_to_hbm [thread:$0]  %s198_s2, 256, %s200_s27, [#allocation3], %s264_s28, %s264_s28, %s265_s29  }
 0x10a   :  { %258 = dma.done.wait [#allocation3], 256  }
 0x10b   :  { %259 = vsyncadd [#allocation3], 4294967040 }
 0x10c   :  { %210 = vsyncpa [#allocation3], 1 }

</bundles_post_ra>
